<compile_context>
chip_gen: v7x
topology: tpu7x:2x2x1
jax: 0.10.0
libtpu: 0.0.40
codegen_flags: <defaults>
</compile_context>

<pallas_src>
import functools

import jax
import jax.numpy as jnp
from jax import lax
from jax.experimental import pallas as pl
from jax.experimental.pallas import tpu as pltpu


def _causal_conv_kernel(*refs, K, dilation, pad, HB, T, use_prev):
    """One (batch, time-tile) grid step.

    refs (pad > 0, use_prev=True):
        x_cur (C_in, T), x_halo (C_in, HB), w (K, C_out, C_in), b (C_out, 1),
        o (C_out, T), win (C_in, HB + T)      [VMEM scratch]
    refs (pad > 0, use_prev=False): same without x_halo.
    refs (pad == 0): x_cur, w, b, o.
    """
    if pad == 0:  # K == 1 degenerate case: plain 1x1 conv
        xc_ref, w_ref, b_ref, o_ref = refs
        acc = jnp.dot(w_ref[0], xc_ref[...], preferred_element_type=jnp.float32)
        o_ref[...] = (acc + b_ref[...]).astype(o_ref.dtype)
        return

    if use_prev:
        xc_ref, xh_ref, w_ref, b_ref, o_ref, win_ref = refs
        j = pl.program_id(1)
        xh = xh_ref[...]
        # Select, not multiply: safe even if the clamped j==0 halo block holds inf/NaN,
        # and avoids a bf16 multiply on v5e.
        win_ref[:, 0:HB] = jnp.where(j > 0, xh, jnp.zeros_like(xh))
    else:
        xc_ref, w_ref, b_ref, o_ref, win_ref = refs
        win_ref[:, 0:HB] = jnp.zeros((xc_ref.shape[0], HB), dtype=win_ref.dtype)

    # Single lane-aligned full-tile store (HB and T are multiples of 128) -- this is
    # the only per-step copy; it replaces the old window/parts/xs concat chain.
    win_ref[:, HB:HB + T] = xc_ref[...]

    # K per-tap matmuls accumulated in f32.  Tap k reads window columns
    # [HB - pad + k*d, HB - pad + k*d + T): static lane offsets, MXU contraction
    # over C_in, no stacked (K*C_in, T) operand is ever materialized.
    acc = None
    for k in range(K):
        s = HB - pad + k * dilation
        part = jnp.dot(w_ref[k], win_ref[:, s:s + T],
                       preferred_element_type=jnp.float32)
        acc = part if acc is None else acc + part
    o_ref[...] = (acc + b_ref[...]).astype(o_ref.dtype)


def _vmem_params():
    """(working-set budget, max time tile, vmem_limit_bytes), per TPU generation."""
    try:
        cap = pltpu.get_tpu_info().vmem_capacity_bytes
    except Exception:
        cap = None
    if cap is None:
        cap = 64 * 1024 * 1024                      # assume the smallest (v7x-like)
    if cap >= 96 * 1024 * 1024:                     # v5e / v6e: 128 MiB VMEM
        return 32 * 1024 * 1024, 8192, 80 * 1024 * 1024
    return 16 * 1024 * 1024, 4096, 48 * 1024 * 1024  # v7x: 64 MiB VMEM


def _vmem_need(t, c_in, c_out, K, HB, itemsize, out_itemsize, n_in_buf):
    need = n_in_buf * c_in * t * itemsize           # pipelined x_cur buffers
    need += 2 * c_in * HB * itemsize                # pipelined halo-block buffers
    need += 2 * c_out * t * out_itemsize            # pipelined output buffers
    if HB > 0:
        need += c_in * (HB + t) * itemsize          # window scratch
    need += 2 * K * c_out * c_in * itemsize         # weights (double-buffered)
    need += 2 * c_out * 4                           # bias
    need += c_out * t * 4                           # f32 accumulator
    return need


def _choose_time_tile(L_pad, c_in, c_out, K, HB, itemsize, out_itemsize,
                      n_in_buf, budget, max_tile):
    """Largest lane-dense (multiple-of-128) tile dividing L_pad under the VMEM budget."""
    cands = []
    t = 128
    while t <= min(L_pad, max_tile):
        if L_pad % t == 0 and (t == L_pad or HB == 0 or (t >= HB and t % HB == 0)):
            cands.append(t)
        t += 128
    if not cands:
        return L_pad
    best = cands[0]
    for t in cands:
        if _vmem_need(t, c_in, c_out, K, HB, itemsize, out_itemsize, n_in_buf) <= budget:
            best = t
    return best


def causal_conv1d(seq, weight_v, weight_g, bias, *, kernel_size, dilation=1,
                  time_tile=None, compute_dtype=None, input_buffers=2):
    """seq: (B, C_in, L) -> (B, C_out, L).  Stride fixed at 1 (causal-trim semantics).

    compute_dtype: optionally run the x / weight streams (and the MXU) in a narrower
    dtype (e.g. jnp.bfloat16) with f32 accumulation: halves HBM traffic for f32
    callers at a small numerical cost.  Default keeps the activation dtype.
    input_buffers: >2 requests deeper input pipelining (pl.Buffered) on the x stream.
    """
    B, C_in, L = seq.shape
    C_out = weight_v.shape[0]
    K = kernel_size
    pad = (K - 1) * dilation
    # TODO(synk): kernel_size == 1 returns the full-length conv; PyTorch's y[:, :, :-0]
    # would return an empty tensor for that degenerate case.
    # TODO(synk): stride != 1 is not implemented (the module's causal trim assumes 1).

    # weight_norm (name='weight', dim=0): w = g * v / ||v||_2 over dims (1, 2), in f32.
    v32 = weight_v.astype(jnp.float32)
    v_norm = jnp.sqrt(jnp.sum(v32 * v32, axis=(1, 2), keepdims=True))
    w32 = weight_g.reshape(C_out, 1, 1).astype(jnp.float32) * v32 / v_norm   # (C_out, C_in, K)

    cdtype = jnp.dtype(compute_dtype) if compute_dtype is not None else jnp.dtype(seq.dtype)
    x = seq.astype(cdtype)
    # (C_out, C_in, K) -> (K, C_out, C_in): per-tap weights; K never in the lane dim.
    w_taps = jnp.transpose(w32, (2, 0, 1)).astype(cdtype)
    b2d = bias.reshape(C_out, 1).astype(jnp.float32)

    itemsize = cdtype.itemsize
    out_itemsize = jnp.dtype(seq.dtype).itemsize

    # Causal halo block width, rounded up to a lane-dense multiple of 128.
    HB = 0 if pad == 0 else ((pad + 127) // 128) * 128

    # Zero-pad L up to a multiple of 128 (right-side zeros never influence y[..., :L]).
    L_pad = max(((L + 127) // 128) * 128, 128)
    if L_pad != L:
        x = jnp.pad(x, ((0, 0), (0, 0), (0, L_pad - L)))

    budget, max_tile, vmem_limit = _vmem_params()
    n_in_buf = max(int(input_buffers), 2)

    T = None
    if time_tile is not None:
        t = int(time_tile)
        if (t % 128 == 0 and L_pad % t == 0
                and (t == L_pad or HB == 0 or (t >= HB and t % HB == 0))):
            T = t
    if T is None:
        T = _choose_time_tile(L_pad, C_in, C_out, K, HB, itemsize, out_itemsize,
                              n_in_buf, budget, max_tile)
    n_lt = L_pad // T
    use_prev = (n_lt > 1) and (pad > 0)

    kernel = functools.partial(_causal_conv_kernel, K=K, dilation=dilation, pad=pad,
                               HB=HB, T=T, use_prev=use_prev)

    def _spec(shape, index_map, buffers):
        if buffers > 2:
            try:   # deeper pipelining of the x stream; fall back if unsupported
                return pl.BlockSpec(shape, index_map, pipeline_mode=pl.Buffered(buffers))
            except Exception:
                pass
        return pl.BlockSpec(shape, index_map)

    in_specs = [_spec((pl.Squeezed(), C_in, T), lambda b, j: (b, 0, j), n_in_buf)]
    args = [x]
    if use_prev:
        bpt = T // HB
        # Only a narrow HB-lane block of the previous tile is re-read (not a full
        # duplicate tile): duplicate x HBM traffic drops from 1x to HB/T per tile.
        in_specs.append(pl.BlockSpec((pl.Squeezed(), C_in, HB),
                                     lambda b, j: (b, 0, jnp.maximum(j * bpt - 1, 0))))
        args.append(x)
    in_specs += [
        pl.BlockSpec((K, C_out, C_in), lambda b, j: (0, 0, 0)),
        pl.BlockSpec((C_out, 1), lambda b, j: (0, 0)),
    ]
    args += [w_taps, b2d]

    scratch_shapes = [pltpu.VMEM((C_in, HB + T), cdtype)] if pad > 0 else []

    cost = pl.CostEstimate(
        flops=2 * B * C_out * C_in * K * L_pad,
        transcendentals=0,
        bytes_accessed=(B * C_in * L_pad + B * n_lt * C_in * HB
                        + K * C_out * C_in) * itemsize
        + C_out * 4
        + B * C_out * L_pad * out_itemsize,
    )

    out = pl.pallas_call(
        kernel,
        out_shape=jax.ShapeDtypeStruct((B, C_out, L_pad), seq.dtype),
        grid_spec=pltpu.PrefetchScalarGridSpec(
            num_scalar_prefetch=0,
            grid=(B, n_lt),
            in_specs=in_specs,
            out_specs=pl.BlockSpec((pl.Squeezed(), C_out, T), lambda b, j: (b, 0, j)),
            scratch_shapes=scratch_shapes,
        ),
        compiler_params=pltpu.CompilerParams(
            dimension_semantics=("parallel", "parallel"),
            vmem_limit_bytes=vmem_limit,
        ),
        cost_estimate=cost,
    )(*args)

    return out if L_pad == L else out[:, :, :L]


def _reference(seq, weight_v, weight_g, bias, *, kernel_size, dilation):
    """Plain-JAX reference matching the PyTorch forward (trim fixed for K==1)."""
    C_out = weight_v.shape[0]
    L = seq.shape[-1]
    pad = (kernel_size - 1) * dilation
    v_norm = jnp.sqrt(jnp.sum(weight_v ** 2, axis=(1, 2), keepdims=True))
    weight = weight_g.reshape(C_out, 1, 1) * weight_v / v_norm
    y = lax.conv_general_dilated(
        seq, weight,
        window_strides=(1,),
        padding=[(pad, pad)],
        rhs_dilation=(dilation,),
        dimension_numbers=("NCH", "OIH", "NCH"),
    )
    y = y + bias.reshape(1, C_out, 1)
    return y[:, :, :L]


if __name__ == "__main__":
    # small shapes consistent with the module's forward (B, C_in, L)
    B, C_in, C_out, L = 2, 4, 6, 16
    kernel_size, dilation = 3, 2

    key = jax.random.PRNGKey(0)
    k_x, k_v, k_g, k_b, k_x2 = jax.random.split(key, 5)
    x = jax.random.normal(k_x, (B, C_in, L), dtype=jnp.float32)
    weight_v = jax.random.normal(k_v, (C_out, C_in, kernel_size), dtype=jnp.float32)
    weight_g = jax.random.normal(k_g, (C_out,), dtype=jnp.float32)
    bias = jax.random.normal(k_b, (C_out,), dtype=jnp.float32)

    out = causal_conv1d(x, weight_v, weight_g, bias,
                        kernel_size=kernel_size, dilation=dilation)
    out = jax.block_until_ready(out)
    ref = _reference(x, weight_v, weight_g, bias,
                     kernel_size=kernel_size, dilation=dilation)
    assert out.shape == (B, C_out, L)
    assert jnp.allclose(out, ref, atol=1e-4, rtol=1e-4)

    # Time-tiled path: causal halo fetched as the previous tile's last 128-lane block.
    L2 = 256
    x2 = jax.random.normal(k_x2, (B, C_in, L2), dtype=jnp.float32)
    out2 = causal_conv1d(x2, weight_v, weight_g, bias,
                         kernel_size=kernel_size, dilation=dilation, time_tile=128)
    out2 = jax.block_until_ready(out2)
    ref2 = _reference(x2, weight_v, weight_g, bias,
                      kernel_size=kernel_size, dilation=dilation)
    assert out2.shape == (B, C_out, L2)
    assert jnp.allclose(out2, ref2, atol=1e-4, rtol=1e-4)

    # Non-multiple-of-128 length: exercises the pad-to-128 wrapper path (no untiled fallback).
    L3 = 200
    x3 = jax.random.normal(k_x, (B, C_in, L3), dtype=jnp.float32)
    out3 = causal_conv1d(x3, weight_v, weight_g, bias,
                         kernel_size=kernel_size, dilation=dilation)
    out3 = jax.block_until_ready(out3)
    ref3 = _reference(x3, weight_v, weight_g, bias,
                      kernel_size=kernel_size, dilation=dilation)
    assert out3.shape == (B, C_out, L3)
    assert jnp.allclose(out3, ref3, atol=1e-4, rtol=1e-4)

    # Optional reduced-precision streaming path (f32 accumulation kept).
    out_bf = causal_conv1d(x2, weight_v, weight_g, bias,
                           kernel_size=kernel_size, dilation=dilation,
                           compute_dtype=jnp.bfloat16)
    out_bf = jax.block_until_ready(out_bf)
    assert out_bf.shape == (B, C_out, L2)
    assert float(jnp.max(jnp.abs(out_bf.astype(jnp.float32) - ref2))) < 0.5

    print("KERNEL_OK")
</pallas_src>

<mosaic_0001>
module attributes {stable_mosaic.version = 11 : i64} {
  func.func @_causal_conv_kernel(%arg0: i32, %arg1: i32, %arg2: memref<1x4x128xf32, #tpu.memory_space<vmem>>, %arg3: memref<3x6x4xf32, #tpu.memory_space<vmem>>, %arg4: memref<6x1xf32, #tpu.memory_space<vmem>>, %arg5: memref<1x6x128xf32, #tpu.memory_space<vmem>>, %arg6: memref<4x256xf32, #tpu.memory_space<vmem>>) attributes {dimension_semantics = [#tpu.dimension_semantics<parallel>, #tpu.dimension_semantics<parallel>], iteration_bounds = array<i64: 2, 1>, scalar_prefetch = 0 : i64, scratch_operands = 1 : i64, tpu.core_type = #tpu.core_type<tc>, window_params = [{transform_indices = @transform_0, window_bounds = array<i64: 1, 4, 128>}, {pipeline_mode = #tpu.pipeline_mode<synchronous>, transform_indices = @transform_1, window_bounds = array<i64: 3, 6, 4>}, {pipeline_mode = #tpu.pipeline_mode<synchronous>, transform_indices = @transform_2, window_bounds = array<i64: 6, 1>}, {transform_indices = @transform_3, window_bounds = array<i64: 1, 6, 128>}]} {
    %cst = arith.constant 0.000000e+00 : f32
    %0 = vector.broadcast %cst : f32 to vector<4x128xf32>
    %c0 = arith.constant 0 : index
    %c0_0 = arith.constant 0 : index
    %1 = vector.load %arg6[%c0, %c0_0] : memref<4x256xf32, #tpu.memory_space<vmem>>, vector<4x128xf32>
    tpu.vector_store %arg6[%c0, %c0_0], %0 {strides = array<i32>} : memref<4x256xf32, #tpu.memory_space<vmem>>, vector<4x128xf32>,
    %c0_1 = arith.constant 0 : index
    %c0_2 = arith.constant 0 : index
    %c0_3 = arith.constant 0 : index
    %2 = vector.load %arg2[%c0_1, %c0_2, %c0_3] : memref<1x4x128xf32, #tpu.memory_space<vmem>>, vector<1x4x128xf32>
    %3 = vector.shape_cast %2 : vector<1x4x128xf32> to vector<4x128xf32>
    %c0_4 = arith.constant 0 : index
    %c128 = arith.constant 128 : index
    %4 = vector.load %arg6[%c0_4, %c128] : memref<4x256xf32, #tpu.memory_space<vmem>>, vector<4x128xf32>
    tpu.vector_store %arg6[%c0_4, %c128], %3 {strides = array<i32>} : memref<4x256xf32, #tpu.memory_space<vmem>>, vector<4x128xf32>,
    %c0_5 = arith.constant 0 : index
    %c0_6 = arith.constant 0 : index
    %c0_7 = arith.constant 0 : index
    %5 = vector.load %arg3[%c0_5, %c0_6, %c0_7] : memref<3x6x4xf32, #tpu.memory_space<vmem>>, vector<1x6x4xf32>
    %6 = vector.shape_cast %5 : vector<1x6x4xf32> to vector<6x4xf32>
    %c0_8 = arith.constant 0 : index
    %c124 = arith.constant 124 : index
    %7 = vector.load %arg6[%c0_8, %c124] : memref<4x256xf32, #tpu.memory_space<vmem>>, vector<4x128xf32>
    %cst_9 = arith.constant dense<0.000000e+00> : vector<6x128xf32>
    %8 = tpu.matmul %6, %7, %cst_9 {dimension_numbers = #tpu.dot_dimension_numbers<[1], [0], [0], [1], [0, 0, 1, 1], [], []>} : vector<6x4xf32>, vector<4x128xf32>, vector<6x128xf32> -> vector<6x128xf32>
    %c1 = arith.constant 1 : index
    %c0_10 = arith.constant 0 : index
    %c0_11 = arith.constant 0 : index
    %9 = vector.load %arg3[%c1, %c0_10, %c0_11] : memref<3x6x4xf32, #tpu.memory_space<vmem>>, vector<1x6x4xf32>
    %10 = vector.shape_cast %9 : vector<1x6x4xf32> to vector<6x4xf32>
    %c0_12 = arith.constant 0 : index
    %c126 = arith.constant 126 : index
    %11 = vector.load %arg6[%c0_12, %c126] : memref<4x256xf32, #tpu.memory_space<vmem>>, vector<4x128xf32>
    %cst_13 = arith.constant dense<0.000000e+00> : vector<6x128xf32>
    %12 = tpu.matmul %10, %11, %cst_13 {dimension_numbers = #tpu.dot_dimension_numbers<[1], [0], [0], [1], [0, 0, 1, 1], [], []>} : vector<6x4xf32>, vector<4x128xf32>, vector<6x128xf32> -> vector<6x128xf32>
    %13 = arith.addf %8, %12 : vector<6x128xf32>
    %c2 = arith.constant 2 : index
    %c0_14 = arith.constant 0 : index
    %c0_15 = arith.constant 0 : index
    %14 = vector.load %arg3[%c2, %c0_14, %c0_15] : memref<3x6x4xf32, #tpu.memory_space<vmem>>, vector<1x6x4xf32>
    %15 = vector.shape_cast %14 : vector<1x6x4xf32> to vector<6x4xf32>
    %c0_16 = arith.constant 0 : index
    %c128_17 = arith.constant 128 : index
    %16 = vector.load %arg6[%c0_16, %c128_17] : memref<4x256xf32, #tpu.memory_space<vmem>>, vector<4x128xf32>
    %cst_18 = arith.constant dense<0.000000e+00> : vector<6x128xf32>
    %17 = tpu.matmul %15, %16, %cst_18 {dimension_numbers = #tpu.dot_dimension_numbers<[1], [0], [0], [1], [0, 0, 1, 1], [], []>} : vector<6x4xf32>, vector<4x128xf32>, vector<6x128xf32> -> vector<6x128xf32>
    %18 = arith.addf %13, %17 : vector<6x128xf32>
    %c0_19 = arith.constant 0 : index
    %c0_20 = arith.constant 0 : index
    %19 = vector.load %arg4[%c0_19, %c0_20] : memref<6x1xf32, #tpu.memory_space<vmem>>, vector<6x1xf32>
    %20 = vector.broadcast %19 : vector<6x1xf32> to vector<6x128xf32>
    %21 = arith.addf %18, %20 : vector<6x128xf32>
    %c0_21 = arith.constant 0 : index
    %c0_22 = arith.constant 0 : index
    %c0_23 = arith.constant 0 : index
    %22 = vector.load %arg5[%c0_21, %c0_22, %c0_23] : memref<1x6x128xf32, #tpu.memory_space<vmem>>, vector<1x6x128xf32>
    %23 = vector.shape_cast %22 : vector<1x6x128xf32> to vector<6x128xf32>
    %24 = vector.shape_cast %21 : vector<6x128xf32> to vector<1x6x128xf32>
    tpu.vector_store %arg5[%c0_21, %c0_22, %c0_23], %24 {strides = array<i32>} : memref<1x6x128xf32, #tpu.memory_space<vmem>>, vector<1x6x128xf32>,
    return
  }
  func.func @transform_0(%arg0: i32, %arg1: i32) -> (i32, i32, i32) {
    %c0_i32 = arith.constant 0 : i32
    %c0_i32_0 = arith.constant 0 : i32
    return %arg0, %c0_i32, %arg1 : i32, i32, i32
  }
  func.func @transform_1(%arg0: i32, %arg1: i32) -> (i32, i32, i32) {
    %c0_i32 = arith.constant 0 : i32
    %c0_i32_0 = arith.constant 0 : i32
    %c0_i32_1 = arith.constant 0 : i32
    %c0_i32_2 = arith.constant 0 : i32
    return %c0_i32, %c0_i32_0, %c0_i32_1 : i32, i32, i32
  }
  func.func @transform_2(%arg0: i32, %arg1: i32) -> (i32, i32) {
    %c0_i32 = arith.constant 0 : i32
    %c0_i32_0 = arith.constant 0 : i32
    %c0_i32_1 = arith.constant 0 : i32
    return %c0_i32, %c0_i32_0 : i32, i32
  }
  func.func @transform_3(%arg0: i32, %arg1: i32) -> (i32, i32, i32) {
    %c0_i32 = arith.constant 0 : i32
    %c0_i32_0 = arith.constant 0 : i32
    return %arg0, %c0_i32, %arg1 : i32, i32, i32
  }
}

</mosaic_0001>

<bundles_post_ra>
// kernel: tpu_custom_call.1
= control target key start
LH: loop header
LB: loop body
LE: loop exit
PB: predicated region body
PF: predicated region fallthrough
CT: control target
= control target key end

     0   :  { %s649_s12 = smov 0   ;;  %s651_s13 = smov 0   ;;  %s705_s0 = inlined_call_operand.vmem [shape: f32[2,4,128], index: 0, kind: input, shape index: {}]   ;;  %s706_s1 = inlined_call_operand.vmem [shape: f32[3,6,4], index: 1, kind: input, shape index: {}]   ;;  %s707_s2 = inlined_call_operand.vmem [shape: f32[6,1], index: 2, kind: input, shape index: {}]   ;;  %s708_s3 = inlined_call_operand.vmem [shape: f32[2,6,128], index: 3, kind: output, shape index: {}]  }
   0x1   :  { %s653_s14 = smov 0  }
   0x2 LB: > { %s25_s15 = sadd.s32 1, %s618_s13  ;;  %p535_p0 = scmp.ge.s32.totalorder %s622_s14, 1  ;;  %s622_s14 = sphi %s653_s14, %s13_s14   ;;  %s618_s13 = sphi %s651_s13, %s710_s13   ;;  %s614_s12 = sphi %s649_s12, %s709_s12  }
   0x3   : > { %p27_p1 = scmp.ge.s32.totalorder %s25_s15, 2  ;;  %p155_p2 = scmp.lt.s32.totalorder %s622_s14, 3 }
   0x5   : > { %s712_s15 = smov (%p27_p1, %s25_s15), 0  ;;  %p156_p3 = pnand %p535_p0, %p155_p2 }
   0x6   : > { %p183_p4 = scmp.lt.s32.totalorder (!%p156_p3), %s614_s12, 1  ;;  %v624_v0 = vmov (!%p156_p3), 0.0   ;;  %vm625_vm0 = vmmov (!%p156_p3), 0   ;;  %v626_v2 = vmov (!%p156_p3), 0   ;;  %s627_s20 = smov (!%p156_p3), 4   ;;  %vm210_vm1 = vcmask (!%p156_p3), 15360  }
   0x7   : > { %159 = sbr.rel (%p156_p3) target bundleno = 368 (0x170), region = 32  ;;  %197 = vst [vmem:[#allocation2] sm:$0xf] (!%p156_p3), %v624_v0  ;;  %554 = vmatprep.subr.mxu0 (!%p156_p3), %v624_v0  ;;  %559 = vmatprep.subr.mxu1 (!%p156_p3), %v624_v0  ;;  %s628_s21 = smov (!%p156_p3), 2   ;;  %v449_v5 = vld [vmem:[%s707_s2] sm:$0x3f] (!%p156_p3) }
   0x8   : > { %556 = vmatprep.mubr.msk.f32.mxu0 (!%p156_p3), %vm625_vm0, %v624_v0  ;;  %561 = vmatprep.mubr.msk.f32.mxu1 (!%p156_p3), %vm625_vm0, %v624_v0  ;;  %vm212_vm2 = vcmask (!%p156_p3), 31744   ;;  %vm216_vm3 = vcmask (!%p156_p3), 1043456   ;;  %v538_v10 = vld [vmem:[%s706_s1 + $0x8] sm:$0x3f] (!%p156_p3)  ;;  %v200_v13 = vld [vmem:[%s706_s1] sm:$0x3f] (!%p156_p3) }
   0x9   : > { %598 = vset.pattern.permute.xlu0 (!%p156_p3), %v626_v2  ;;  %v543_v15 = vld [vmem:[%s706_s1 + $0x10] sm:$0x3f] (!%p156_p3) }
   0xe   : > { %s714_s12 = smov (!%p183_p4, %s614_s12), 1 }
   0xf   : > { %s536_s16 = sshll.u32 %s714_s12, 2  ;;  %s537_s30 = sshll.u32 %s714_s12, 3 }
  0x10   : > { %s189_s19 = scalar_lea.vmem %s705_s0, %s536_s16  ;;  %s196_s6 = scalar_lea.vmem %s708_s3, %s537_s30 }
  0x11   : > { %v198_v1 = vld [vmem:[%s189_s19] sm:$0xf] }
  0x12   : > { %199 = vst [vmem:[#allocation2 + $0x4] sm:$0xf] %v198_v1 }
  0x19   : > { %v201_v3 = vld [vmem:[#allocation2] sm:$0xff] }
  0x1a   : > { %289 = vrot.lane.b32.xlu1 %v201_v3, %s627_s20  ;;  %206 = vrot.lane.b32.xlu0 %v201_v3, %s628_s21  ;;  %v205_v4 = vcombine.high %v201_v3, %v201_v3  ;;  %v371_v14 = vld [vmem:[#allocation2 + $0x4] sm:$0xf] }
  0x1e   : > { %291 = vrot.lane.b32.xlu1 %v205_v4, %s627_s20  ;;  %208 = vrot.lane.b32.xlu0 %v205_v4, %s628_s21 }
  0x22   : > { %452 = vperm.xlu0 %598, %v449_v5  }
  0x8c   : > { %v290_v6 = vpop.permute.xlu1 %289  ;;  %v207_v7 = vpop.permute.xlu0 %206 }
  0x90   : > { %v292_v8 = vpop.permute.xlu1 %291  ;;  %v209_v9 = vpop.permute.xlu0 %208 }
  0x91   : > { %v211_v11 = vsel %vm210_vm1, %v207_v7, %v209_v9  ;;  %v293_v12 = vsel %vm212_vm2, %v290_v6, %v292_v8 }
  0x92   : > { %555 = vmatpush3.msk.msra.mxu0 %vm216_vm3, %v211_v11  ;;  %560 = vmatpush3.msk.msra.mxu1 %vm216_vm3, %v293_v12 }
  0x93   : > { %557 = vmatmul.mubr.msk.f32.vlgmr.msra.gmra.mrb[0].mxu0 %vm212_vm2, %v538_v10  ;;  %564 = vmatprep.subr.mxu0 %v624_v0 }
  0x94   : > { %562 = vmatmul.mubr.msk.f32.vlgmr.msra.gmra.mrb[0].mxu1 %vm212_vm2, %v200_v13  ;;  %565 = vmatpush3.msk.msra.mxu0 %vm216_vm3, %v371_v14 }
  0x95   : > { %566 = vmatprep.mubr.msk.f32.mxu0 %vm625_vm0, %v624_v0 }
  0x97   : > { %567 = vmatmul.mubr.msk.f32.vlgmr.msra.gmra.mrb[2].mxu0 %vm212_vm2, %v543_v15 }
  0xa1   : > { %v453_v22 = vpop.permute.xlu0 %452 }
 0x166   : > { %v285_v16 = vpop.f32.mrb[0].mxu0 }
 0x167   : > { %v558_v17 = vpop.f32.mrb[1].mxu0  ;;  %v365_v18 = vpop.f32.mrb[0].mxu1 }
 0x168   : > { %v366_v19 = vadd.f32 %v365_v18, %v285_v16  ;;  %v563_v20 = vpop.f32.mrb[1].mxu1 }
 0x16a   : > { %v444_v21 = vpop.f32.mrb[2].mxu0 }
 0x16b   : > { %v448_v23 = vadd.f32 %v444_v21, %v366_v19  ;;  %v568_v24 = vpop.f32.mrb[3].mxu0 }
 0x16d   : > { %v455_v25 = vadd.f32 %v453_v22, %v448_v23 }
 0x16f   : > { %456 = vst [vmem:[%s196_s6] sm:$0x3f] %v455_v25 }
 0x170 PF: > { %s13_s14 = sadd.s32 1, %s622_s14   ;;  %s709_s12 = smov %s618_s13 }
 0x171   : > { %p10_p5 = scmp.ge.s32.totalorder %s13_s14, 4   ;;  %s710_s13 = smov %s712_s15 }
 0x173   :  { %12 = sbr.rel (!%p10_p5) target bundleno = 2 (0x2), region = 64 }

</bundles_post_ra>
